<compile_context>
chip_gen: v6e
topology: v6e:2x2x1
jax: 0.10.0
libtpu: 0.0.40
codegen_flags: <defaults>
</compile_context>

<pallas_src>
import jax
import jax.numpy as jnp
from jax.experimental import pallas as pl
from jax.experimental.pallas import tpu as pltpu

input_size = 784
hidden_size = 500
num_classes = 10


def mlp_kernel(x_ref, w1_ref, b1_ref, w2_ref, b2_ref, out_ref):
    # fc1: (TM, 784)bf16 @ (784, 500)bf16 -> f32 accumulator on the MXU
    h = jnp.dot(x_ref[...], w1_ref[...], preferred_element_type=jnp.float32)
    # bias + ReLU in f32 (correct on v5e where VPU has no bf16 path)
    h = jnp.maximum(h + b1_ref[...], 0.0)
    # fc2: (TM, 500) @ (500, 10) -> f32 accumulator
    o = jnp.dot(h.astype(w2_ref.dtype), w2_ref[...],
                preferred_element_type=jnp.float32)
    out_ref[...] = (o + b2_ref[...]).astype(out_ref.dtype)


def neural_net_forward(x, w1, b1, w2, b2, *, tm=256):
    """x: (B, input_size); w1: (input_size, hidden) bf16; b1: (1, hidden) f32;
    w2: (hidden, num_classes) bf16; b2: (1, num_classes) f32.
    Returns (B, num_classes) f32."""
    B = x.shape[0]
    x = x.astype(jnp.bfloat16)

    # Batch tile: TM=256 fills the v6e/v7x MXU M dimension; if the batch is
    # smaller, a single full-batch block is always a legal block shape.
    TM = B if B <= tm else tm
    Bp = pl.cdiv(B, TM) * TM
    if Bp != B:
        x = jnp.pad(x, ((0, Bp - B), (0, 0)))

    flops = 2 * B * (input_size * hidden_size + hidden_size * num_classes)
    bytes_accessed = (
        Bp * input_size * 2                      # x (bf16)
        + w1.size * 2 + w2.size * 2              # weights (bf16)
        + b1.size * 4 + b2.size * 4              # biases (f32)
        + Bp * num_classes * 4                   # output (f32)
    )

    out = pl.pallas_call(
        mlp_kernel,
        out_shape=jax.ShapeDtypeStruct((Bp, num_classes), jnp.float32),
        grid=(Bp // TM,),
        in_specs=[
            pl.BlockSpec((TM, input_size), lambda i: (i, 0)),   # x: tiled over batch
            pl.BlockSpec(w1.shape, lambda i: (0, 0)),           # weights/bias stay
            pl.BlockSpec(b1.shape, lambda i: (0, 0)),           # VMEM-resident
            pl.BlockSpec(w2.shape, lambda i: (0, 0)),
            pl.BlockSpec(b2.shape, lambda i: (0, 0)),
        ],
        out_specs=pl.BlockSpec((TM, num_classes), lambda i: (i, 0)),
        compiler_params=pltpu.CompilerParams(
            dimension_semantics=("parallel",),   # shard batch tiles across TCs (v7x)
            vmem_limit_bytes=16 << 20,           # honest limit; footprint ~3 MiB
        ),
        cost_estimate=pl.CostEstimate(
            flops=flops, transcendentals=0, bytes_accessed=bytes_accessed),
    )(x, w1, b1, w2, b2)

    return out[:B] if Bp != B else out


def init_params(key):
    """Mimics nn.Linear's U(-1/sqrt(fan_in), 1/sqrt(fan_in)); weights stored
    bf16 (transposed to (in, out)), biases f32."""
    k1, k2, k3, k4 = jax.random.split(key, 4)
    bound1 = 1.0 / jnp.sqrt(jnp.float32(input_size))
    bound2 = 1.0 / jnp.sqrt(jnp.float32(hidden_size))
    w1 = jax.random.uniform(k1, (input_size, hidden_size), jnp.float32,
                            -bound1, bound1).astype(jnp.bfloat16)
    b1 = jax.random.uniform(k2, (1, hidden_size), jnp.float32, -bound1, bound1)
    w2 = jax.random.uniform(k3, (hidden_size, num_classes), jnp.float32,
                            -bound2, bound2).astype(jnp.bfloat16)
    b2 = jax.random.uniform(k4, (1, num_classes), jnp.float32, -bound2, bound2)
    return w1, b1, w2, b2


if __name__ == "__main__":
    key = jax.random.PRNGKey(0)
    kx, kp = jax.random.split(key)
    batch = 16
    x = jax.random.normal(kx, (batch, input_size), jnp.float32)
    w1, b1, w2, b2 = init_params(kp)

    out = jax.block_until_ready(neural_net_forward(x, w1, b1, w2, b2))

    # Pure-JAX reference using the same bf16-rounded inputs, f32 math.
    xb = x.astype(jnp.bfloat16).astype(jnp.float32)
    h = jnp.maximum(xb @ w1.astype(jnp.float32) + b1, 0.0)
    ref = h.astype(jnp.bfloat16).astype(jnp.float32) @ w2.astype(jnp.float32) + b2

    assert out.shape == (batch, num_classes)
    assert jnp.allclose(out, ref, atol=3e-2, rtol=3e-2), \
        float(jnp.max(jnp.abs(out - ref)))

    print("KERNEL_OK")
</pallas_src>

<mosaic_0001>
module attributes {stable_mosaic.version = 11 : i64} {
  func.func @mlp_kernel(%arg0: i32, %arg1: memref<16x784xbf16, #tpu.memory_space<vmem>>, %arg2: memref<784x500xbf16, #tpu.memory_space<vmem>>, %arg3: memref<1x500xf32, #tpu.memory_space<vmem>>, %arg4: memref<500x10xbf16, #tpu.memory_space<vmem>>, %arg5: memref<1x10xf32, #tpu.memory_space<vmem>>, %arg6: memref<16x10xf32, #tpu.memory_space<vmem>>) attributes {dimension_semantics = [#tpu.dimension_semantics<parallel>], iteration_bounds = array<i64: 1>, scalar_prefetch = 0 : i64, scratch_operands = 0 : i64, tpu.core_type = #tpu.core_type<tc>, window_params = [{transform_indices = @transform_0, window_bounds = array<i64: 16, 784>}, {pipeline_mode = #tpu.pipeline_mode<synchronous>, transform_indices = @transform_1, window_bounds = array<i64: 784, 500>}, {pipeline_mode = #tpu.pipeline_mode<synchronous>, transform_indices = @transform_2, window_bounds = array<i64: 1, 500>}, {pipeline_mode = #tpu.pipeline_mode<synchronous>, transform_indices = @transform_3, window_bounds = array<i64: 500, 10>}, {pipeline_mode = #tpu.pipeline_mode<synchronous>, transform_indices = @transform_4, window_bounds = array<i64: 1, 10>}, {transform_indices = @transform_5, window_bounds = array<i64: 16, 10>}]} {
    %c0 = arith.constant 0 : index
    %c0_0 = arith.constant 0 : index
    %0 = vector.load %arg1[%c0, %c0_0] : memref<16x784xbf16, #tpu.memory_space<vmem>>, vector<16x784xbf16>
    %c0_1 = arith.constant 0 : index
    %c0_2 = arith.constant 0 : index
    %1 = vector.load %arg2[%c0_1, %c0_2] : memref<784x500xbf16, #tpu.memory_space<vmem>>, vector<784x500xbf16>
    %cst = arith.constant dense<0.000000e+00> : vector<16x500xf32>
    %2 = tpu.matmul %0, %1, %cst {dimension_numbers = #tpu.dot_dimension_numbers<[1], [0], [0], [1], [0, 0, 1, 1], [], []>} : vector<16x784xbf16>, vector<784x500xbf16>, vector<16x500xf32> -> vector<16x500xf32>
    %c0_3 = arith.constant 0 : index
    %c0_4 = arith.constant 0 : index
    %3 = vector.load %arg3[%c0_3, %c0_4] : memref<1x500xf32, #tpu.memory_space<vmem>>, vector<1x500xf32>
    %4 = vector.broadcast %3 : vector<1x500xf32> to vector<16x500xf32>
    %5 = arith.addf %2, %4 : vector<16x500xf32>
    %cst_5 = arith.constant 0.000000e+00 : f32
    %6 = vector.broadcast %cst_5 : f32 to vector<16x500xf32>
    %7 = arith.maximumf %5, %6 : vector<16x500xf32>
    %8 = arith.truncf %7 : vector<16x500xf32> to vector<16x500xbf16>
    %c0_6 = arith.constant 0 : index
    %c0_7 = arith.constant 0 : index
    %9 = vector.load %arg4[%c0_6, %c0_7] : memref<500x10xbf16, #tpu.memory_space<vmem>>, vector<500x10xbf16>
    %cst_8 = arith.constant dense<0.000000e+00> : vector<16x10xf32>
    %10 = tpu.matmul %8, %9, %cst_8 {dimension_numbers = #tpu.dot_dimension_numbers<[1], [0], [0], [1], [0, 0, 1, 1], [], []>} : vector<16x500xbf16>, vector<500x10xbf16>, vector<16x10xf32> -> vector<16x10xf32>
    %c0_9 = arith.constant 0 : index
    %c0_10 = arith.constant 0 : index
    %11 = vector.load %arg5[%c0_9, %c0_10] : memref<1x10xf32, #tpu.memory_space<vmem>>, vector<1x10xf32>
    %12 = vector.broadcast %11 : vector<1x10xf32> to vector<16x10xf32>
    %13 = arith.addf %10, %12 : vector<16x10xf32>
    %c0_11 = arith.constant 0 : index
    %c0_12 = arith.constant 0 : index
    %14 = vector.load %arg6[%c0_11, %c0_12] : memref<16x10xf32, #tpu.memory_space<vmem>>, vector<16x10xf32>
    tpu.vector_store %arg6[%c0_11, %c0_12], %13 {strides = array<i32>} : memref<16x10xf32, #tpu.memory_space<vmem>>, vector<16x10xf32>,
    return
  }
  func.func @transform_0(%arg0: i32) -> (i32, i32) {
    %c0_i32 = arith.constant 0 : i32
    %c0_i32_0 = arith.constant 0 : i32
    return %arg0, %c0_i32 : i32, i32
  }
  func.func @transform_1(%arg0: i32) -> (i32, i32) {
    %c0_i32 = arith.constant 0 : i32
    %c0_i32_0 = arith.constant 0 : i32
    %c0_i32_1 = arith.constant 0 : i32
    return %c0_i32, %c0_i32_0 : i32, i32
  }
  func.func @transform_2(%arg0: i32) -> (i32, i32) {
    %c0_i32 = arith.constant 0 : i32
    %c0_i32_0 = arith.constant 0 : i32
    %c0_i32_1 = arith.constant 0 : i32
    return %c0_i32, %c0_i32_0 : i32, i32
  }
  func.func @transform_3(%arg0: i32) -> (i32, i32) {
    %c0_i32 = arith.constant 0 : i32
    %c0_i32_0 = arith.constant 0 : i32
    %c0_i32_1 = arith.constant 0 : i32
    return %c0_i32, %c0_i32_0 : i32, i32
  }
  func.func @transform_4(%arg0: i32) -> (i32, i32) {
    %c0_i32 = arith.constant 0 : i32
    %c0_i32_0 = arith.constant 0 : i32
    %c0_i32_1 = arith.constant 0 : i32
    return %c0_i32, %c0_i32_0 : i32, i32
  }
  func.func @transform_5(%arg0: i32) -> (i32, i32) {
    %c0_i32 = arith.constant 0 : i32
    %c0_i32_0 = arith.constant 0 : i32
    return %arg0, %c0_i32 : i32, i32
  }
}

</mosaic_0001>

<bundles_post_ra>
// kernel: tpu_custom_call.1
= control target key start
LH: loop header
LB: loop body
LE: loop exit
PB: predicated region body
PF: predicated region fallthrough
CT: control target
= control target key end

     0   :  { %10 = vsyncpa [#allocation3], 0  ;;  %s2875_s0 = inlined_call_operand.vmem [shape: bf16[16,784], index: 0, kind: input, shape index: {}]   ;;  %s2876_s1 = inlined_call_operand.hbm [shape: bf16[784,500], index: 1, kind: input, shape index: {}]   ;;  %s2877_s2 = inlined_call_operand.vmem [shape: f32[1,500], index: 2, kind: input, shape index: {}]   ;;  %s2878_s3 = inlined_call_operand.vmem [shape: bf16[500,10], index: 3, kind: input, shape index: {}]   ;;  %s2879_s4 = inlined_call_operand.vmem [shape: f32[1,10], index: 4, kind: input, shape index: {}]   ;;  %s2880_s5 = inlined_call_operand.hbm [shape: f32[16,10], index: 5, kind: output, shape index: {}]  }
   0x1   :  { %11 = vsyncpa [#allocation4], 0  ;;  %s2677_s18 = smov [#allocation2]  }
   0x2   :  { %s19_s19 = sshll.u32 %s2677_s18, 4  ;;  %s20_s19 = int_to_ptr.vmem [resolvable:$true] %s19_s19 }
   0x3   :  { %s2641_s20 = scalar_lea.vmem %s20_s19, 25088  ;;  %p2646_p1 = scmp.lt.s32.totalorder %s20_s19, %s20_s19 }
   0x4   :  { %p2642_p0 = scmp.ne.s32.totalorder %s20_s19, %s2641_s20  ;;  %p2647_p2 = scmp.lt.s32.totalorder %s2641_s20, %s2641_s20 }
   0x6   :  { %p2648_p3 = por %p2647_p2, %p2646_p1 }
   0x8   :  { %p2649_p4 = pnand %p2648_p3, %p2642_p0 }
   0xa   :  { %2652 = shalt.err (!%p2649_p4)
}
   0xb   :  { %s2678_s21 = smov 256   ;;  %s2679_s22 = smov 16  }
   0xc   :  { %25 = dma.hbm_to_vmem [thread:$0]  %s2876_s1, 25088, %s20_s19, [#allocation3], %s2678_s21, %s2678_s21, %s2679_s22  }
   0xd   :  { %2673 = dma.done.wait [#allocation3], 25088  }
   0xe   :  { %2674 = vsyncadd [#allocation3], 4294942208  ;;  %v2297_v0 = vld [vmem:[#allocation2 + $0xe4] ss:$16 sps:$4 sm:$0xff]   ;;  %v2301_v2 = vld [vmem:[#allocation2 + $0xe0] ss:$16 sps:$4 sm:$0xff]  }
   0xf   :  { %v2299_v1 = vld [vmem:[#allocation2 + $0x2e4] ss:$16 sps:$4 sm:$0xff]   ;;  %1281 = vmatprep.subr.bf16.mxu0 %v2297_v0  ;;  %v2302_v3 = vld [vmem:[#allocation2 + $0x2e0] ss:$16 sps:$4 sm:$0xff]   ;;  %v2725_v51 = vld [vmem:[%s2875_s0 + $0xc] ss:$28 sps:$4 sm:$0xff]  }
  0x10   :  { %1324 = vmatprep.subr.bf16.mxu1 %v2299_v1  ;;  %v2303_v4 = vld [vmem:[#allocation2 + $0xc4] ss:$16 sps:$4 sm:$0xff]   ;;  %1282 = vmatpush1.bf16.msra.mxu0 %v2301_v2  ;;  %v2307_v6 = vld [vmem:[#allocation2 + $0xc0] ss:$16 sps:$4 sm:$0xff]   ;;  %vm1277_vm0 = vcmask 130048   ;;  %vm1900_vm1 = vcmask 1041408  }
  0x11   :  { %1325 = vmatpush1.bf16.msra.mxu1 %v2302_v3  ;;  %v2305_v5 = vld [vmem:[#allocation2 + $0x2c4] ss:$16 sps:$4 sm:$0xff]   ;;  %1283 = vmatprep.subr.bf16.mxu0 %v2303_v4  ;;  %v2308_v7 = vld [vmem:[#allocation2 + $0x2c0] ss:$16 sps:$4 sm:$0xff]   ;;  %vm1896_vm2 = vcmask 949248   ;;  %vm1986_vm3 = vcmask 80896  }
  0x12   :  { %1326 = vmatprep.subr.bf16.mxu1 %v2305_v5  ;;  %v2309_v8 = vld [vmem:[#allocation2 + $0xa4] ss:$16 sps:$4 sm:$0xff]   ;;  %v2313_v10 = vld [vmem:[#allocation2 + $0xa0] ss:$16 sps:$4 sm:$0xff]   ;;  %1356 = vmatprep.mubr.bf16.mxu1 %v2725_v51  ;;  %s2681_s24 = smov [#allocation5]  }
  0x13   :  { %v2311_v9 = vld [vmem:[#allocation2 + $0x2a4] ss:$16 sps:$4 sm:$0xff]   ;;  %v2314_v11 = vld [vmem:[#allocation2 + $0x2a0] ss:$16 sps:$4 sm:$0xff]   ;;  %s1994_s1 = sshll.u32 %s2681_s24, 4  ;;  %s1995_s1 = int_to_ptr.vmem [resolvable:$true] %s1994_s1 }
  0x14   :  { %1284 = vmatpush1.bf16.msra.mxu0 %v2307_v6  ;;  %v2315_v12 = vld [vmem:[#allocation2 + $0x84] ss:$16 sps:$4 sm:$0xff]   ;;  %v2319_v14 = vld [vmem:[#allocation2 + $0x80] ss:$16 sps:$4 sm:$0xff]   ;;  %s2653_s25 = scalar_lea.vmem %s1995_s1, 256  ;;  %p2658_p6 = scmp.lt.s32.totalorder %s1995_s1, %s1995_s1 }
  0x15   :  { %1327 = vmatpush1.bf16.msra.mxu1 %v2308_v7  ;;  %1285 = vmatprep.subr.bf16.mxu0 %v2309_v8  ;;  %v2317_v13 = vld [vmem:[#allocation2 + $0x284] ss:$16 sps:$4 sm:$0xff]   ;;  %v2320_v15 = vld [vmem:[#allocation2 + $0x280] ss:$16 sps:$4 sm:$0xff]   ;;  %p2654_p5 = scmp.ne.s32.totalorder %s1995_s1, %s2653_s25  ;;  %p2659_p7 = scmp.lt.s32.totalorder %s2653_s25, %s2653_s25 }
  0x16   :  { %1328 = vmatprep.subr.bf16.mxu1 %v2311_v9  ;;  %v2321_v16 = vld [vmem:[#allocation2 + $0x64] ss:$16 sps:$4 sm:$0xff]   ;;  %v2325_v18 = vld [vmem:[#allocation2 + $0x60] ss:$16 sps:$4 sm:$0xff]   ;;  %v2410_v9 = vld [vmem:[#allocation2 + $0xec] ss:$16 sps:$4 sm:$0xff]  }
  0x17   :  { %v2323_v17 = vld [vmem:[#allocation2 + $0x264] ss:$16 sps:$4 sm:$0xff]   ;;  %v2326_v19 = vld [vmem:[#allocation2 + $0x260] ss:$16 sps:$4 sm:$0xff]   ;;  %p2660_p8 = por %p2659_p7, %p2658_p6 }
  0x18   :  { %1286 = vmatpush1.bf16.msra.mxu0 %v2313_v10  ;;  %v2327_v20 = vld [vmem:[#allocation2 + $0x44] ss:$16 sps:$4 sm:$0xff]   ;;  %v2331_v22 = vld [vmem:[#allocation2 + $0x40] ss:$16 sps:$4 sm:$0xff]  }
  0x19   :  { %1329 = vmatpush1.bf16.msra.mxu1 %v2314_v11  ;;  %1287 = vmatprep.subr.bf16.mxu0 %v2315_v12  ;;  %v2329_v21 = vld [vmem:[#allocation2 + $0x244] ss:$16 sps:$4 sm:$0xff]   ;;  %v2332_v23 = vld [vmem:[#allocation2 + $0x240] ss:$16 sps:$4 sm:$0xff]   ;;  %v2680_v11 = vmov 0   ;;  %p2661_p9 = pnand %p2660_p8, %p2654_p5 }
  0x1a   :  { %1330 = vmatprep.subr.bf16.mxu1 %v2317_v13  ;;  %v2333_v24 = vld [vmem:[#allocation2 + $0x24] ss:$16 sps:$4 sm:$0xff]   ;;  %v2337_v26 = vld [vmem:[#allocation2 + $0x20] ss:$16 sps:$4 sm:$0xff]   ;;  %v2408_v13 = vld [vmem:[#allocation2 + $0xe8] ss:$16 sps:$4 sm:$0xff]  }
  0x1b   :  { %v2335_v25 = vld [vmem:[#allocation2 + $0x224] ss:$16 sps:$4 sm:$0xff]   ;;  %v2338_v27 = vld [vmem:[#allocation2 + $0x220] ss:$16 sps:$4 sm:$0xff]  }
  0x1c   :  { %1288 = vmatpush1.bf16.msra.mxu0 %v2319_v14  ;;  %v2339_v28 = vld [vmem:[#allocation2 + $0x4] ss:$16 sps:$4 sm:$0xff]   ;;  %v2343_v30 = vld [vmem:[#allocation2] ss:$16 sps:$4 sm:$0xff]  }
  0x1d   :  { %1331 = vmatpush1.bf16.msra.mxu1 %v2320_v15  ;;  %1289 = vmatprep.subr.bf16.mxu0 %v2321_v16  ;;  %v2341_v29 = vld [vmem:[#allocation2 + $0x204] ss:$16 sps:$4 sm:$0xff]   ;;  %v2344_v31 = vld [vmem:[#allocation2 + $0x200] ss:$16 sps:$4 sm:$0xff]   ;;  %v2417_v16 = vld [vmem:[#allocation2 + $0xcc] ss:$16 sps:$4 sm:$0xff]  }
  0x1e   :  { %1332 = vmatprep.subr.bf16.mxu1 %v2323_v17  ;;  %v2345_v32 = vld [vmem:[#allocation2 + $0x1e4] ss:$16 sps:$4 sm:$0xff]   ;;  %v2349_v34 = vld [vmem:[#allocation2 + $0x1e0] ss:$16 sps:$4 sm:$0xff]  }
  0x1f   :  { %v2347_v33 = vld [vmem:[#allocation2 + $0x3e4] ss:$16 sps:$4 sm:$0xff]   ;;  %v2350_v35 = vld [vmem:[#allocation2 + $0x3e0] ss:$16 sps:$4 sm:$0xff]  }
  0x20   :  { %1290 = vmatpush1.bf16.msra.mxu0 %v2325_v18  ;;  %v2351_v36 = vld [vmem:[#allocation2 + $0x1c4] ss:$16 sps:$4 sm:$0xff]   ;;  %v2355_v38 = vld [vmem:[#allocation2 + $0x1c0] ss:$16 sps:$4 sm:$0xff]   ;;  %v2415_v18 = vld [vmem:[#allocation2 + $0xc8] ss:$16 sps:$4 sm:$0xff]  }
  0x21   :  { %1333 = vmatpush1.bf16.msra.mxu1 %v2326_v19  ;;  %1291 = vmatprep.subr.bf16.mxu0 %v2327_v20  ;;  %v2353_v37 = vld [vmem:[#allocation2 + $0x3c4] ss:$16 sps:$4 sm:$0xff]   ;;  %v2356_v39 = vld [vmem:[#allocation2 + $0x3c0] ss:$16 sps:$4 sm:$0xff]   ;;  %v2423_v20 = vld [vmem:[#allocation2 + $0xac] ss:$16 sps:$4 sm:$0xff]  }
  0x22   :  { %1334 = vmatprep.subr.bf16.mxu1 %v2329_v21  ;;  %v2357_v40 = vld [vmem:[#allocation2 + $0x1a4] ss:$16 sps:$4 sm:$0xff]   ;;  %v2361_v42 = vld [vmem:[#allocation2 + $0x1a0] ss:$16 sps:$4 sm:$0xff]  }
  0x23   :  { %v2359_v41 = vld [vmem:[#allocation2 + $0x3a4] ss:$16 sps:$4 sm:$0xff]   ;;  %v2362_v43 = vld [vmem:[#allocation2 + $0x3a0] ss:$16 sps:$4 sm:$0xff]  }
  0x24   :  { %1292 = vmatpush1.bf16.msra.mxu0 %v2331_v22  ;;  %v2363_v44 = vld [vmem:[#allocation2 + $0x184] ss:$16 sps:$4 sm:$0xff]   ;;  %v2367_v46 = vld [vmem:[#allocation2 + $0x180] ss:$16 sps:$4 sm:$0xff]   ;;  %v2421_v22 = vld [vmem:[#allocation2 + $0xa8] ss:$16 sps:$4 sm:$0xff]  }
  0x25   :  { %1335 = vmatpush1.bf16.msra.mxu1 %v2332_v23  ;;  %1293 = vmatprep.subr.bf16.mxu0 %v2333_v24  ;;  %v2365_v45 = vld [vmem:[#allocation2 + $0x384] ss:$16 sps:$4 sm:$0xff]   ;;  %v2368_v47 = vld [vmem:[#allocation2 + $0x380] ss:$16 sps:$4 sm:$0xff]   ;;  %v2429_v24 = vld [vmem:[#allocation2 + $0x8c] ss:$16 sps:$4 sm:$0xff]  }
  0x26   :  { %1336 = vmatprep.subr.bf16.mxu1 %v2335_v25  ;;  %v2369_v48 = vld [vmem:[#allocation2 + $0x164] ss:$16 sps:$4 sm:$0xff]   ;;  %v2373_v52 = vld [vmem:[#allocation2 + $0x160] ss:$16 sps:$4 sm:$0xff]  }
  0x27   :  { %v2720_v49 = vld [vmem:[%s2875_s0 + $0x4] ss:$28 sps:$4 sm:$0xff]   ;;  %v2745_v14 = vld [vmem:[%s2875_s0 + $0x18] ss:$28 sps:$4 sm:$0xff]  }
  0x28   :  { %1294 = vmatpush1.bf16.msra.mxu0 %v2337_v26  ;;  %v2371_v50 = vld [vmem:[#allocation2 + $0x364] ss:$16 sps:$4 sm:$0xff]   ;;  %1313 = vmatprep.mubr.bf16.mxu0 %v2720_v49  ;;  %v2374_v53 = vld [vmem:[#allocation2 + $0x360] ss:$16 sps:$4 sm:$0xff]   ;;  %v2427_v26 = vld [vmem:[#allocation2 + $0x88] ss:$16 sps:$4 sm:$0xff]  }
  0x29   :  { %1337 = vmatpush1.bf16.msra.mxu1 %v2338_v27  ;;  %1295 = vmatprep.subr.bf16.mxu0 %v2339_v28  ;;  %v2375_v54 = vld [vmem:[#allocation2 + $0x144] ss:$16 sps:$4 sm:$0xff]   ;;  %v2379_v56 = vld [vmem:[#allocation2 + $0x140] ss:$16 sps:$4 sm:$0xff]   ;;  %v2435_v28 = vld [vmem:[#allocation2 + $0x6c] ss:$16 sps:$4 sm:$0xff]  }
  0x2a   :  { %1338 = vmatprep.subr.bf16.mxu1 %v2341_v29  ;;  %v2377_v55 = vld [vmem:[#allocation2 + $0x344] ss:$16 sps:$4 sm:$0xff]   ;;  %v2380_v57 = vld [vmem:[#allocation2 + $0x340] ss:$16 sps:$4 sm:$0xff]  }
  0x2b   :  { %v2381_v58 = vld [vmem:[#allocation2 + $0x124] ss:$16 sps:$4 sm:$0xff]   ;;  %v2385_v60 = vld [vmem:[#allocation2 + $0x120] ss:$16 sps:$4 sm:$0xff]  }
  0x2c   :  { %1296 = vmatpush1.bf16.msra.mxu0 %v2343_v30  ;;  %v2383_v59 = vld [vmem:[#allocation2 + $0x324] ss:$16 sps:$4 sm:$0xff]   ;;  %v2386_v61 = vld [vmem:[#allocation2 + $0x320] ss:$16 sps:$4 sm:$0xff]   ;;  %v2433_v30 = vld [vmem:[#allocation2 + $0x68] ss:$16 sps:$4 sm:$0xff]  }
  0x2d   :  { %1339 = vmatpush1.bf16.msra.mxu1 %v2344_v31  ;;  %1297 = vmatprep.subr.bf16.mxu0 %v2345_v32  ;;  %v2387_v62 = vld [vmem:[#allocation2 + $0x104] ss:$16 sps:$4 sm:$0xff]   ;;  %v2391_v0 = vld [vmem:[#allocation2 + $0x100] ss:$16 sps:$4 sm:$0xff]   ;;  %v2441_v32 = vld [vmem:[#allocation2 + $0x4c] ss:$16 sps:$4 sm:$0xff]  }
  0x2e   :  { %1340 = vmatprep.subr.bf16.mxu1 %v2347_v33  ;;  %v2389_v63 = vld [vmem:[#allocation2 + $0x304] ss:$16 sps:$4 sm:$0xff]   ;;  %v2392_v1 = vld [vmem:[#allocation2 + $0x300] ss:$16 sps:$4 sm:$0xff]  }
  0x2f   :  { %v2401_v2 = vld [vmem:[#allocation2 + $0x4e4] ss:$16 sps:$4 sm:$0xff]   ;;  %v2732_v4 = vld [vmem:[%s2875_s0] ss:$28 sps:$4 sm:$0xff]  }
  0x30   :  { %1298 = vmatpush2.bf16.msra.mxu0 %v2349_v34  ;;  %v2404_v3 = vld [vmem:[#allocation2 + $0x604] ss:$16 sps:$4 sm:$0xff]   ;;  %v2399_v6 = vld [vmem:[#allocation2 + $0x4e0] ss:$16 sps:$4 sm:$0xff]  }
  0x31   :  { %1341 = vmatpush2.bf16.msra.mxu1 %v2350_v35  ;;  %1299 = vmatprep.subr.bf16.mxu0 %v2351_v36  ;;  %v2737_v5 = vld [vmem:[%s2875_s0 + $0x8] ss:$28 sps:$4 sm:$0xff]   ;;  %v2402_v7 = vld [vmem:[#allocation2 + $0x600] ss:$16 sps:$4 sm:$0xff]  }
  0x32   :  { %1342 = vmatprep.subr.bf16.mxu1 %v2353_v37  ;;  %v2407_v8 = vld [vmem:[#allocation2 + $0x4c4] ss:$16 sps:$4 sm:$0xff]   ;;  %v2405_v10 = vld [vmem:[#allocation2 + $0x4c0] ss:$16 sps:$4 sm:$0xff]   ;;  %v2439_v35 = vld [vmem:[#allocation2 + $0x48] ss:$16 sps:$4 sm:$0xff]  }
  0x33   :  { %v2413_v12 = vld [vmem:[#allocation2 + $0x4a4] ss:$16 sps:$4 sm:$0xff]   ;;  %v2411_v15 = vld [vmem:[#allocation2 + $0x4a0] ss:$16 sps:$4 sm:$0xff]   ;;  %v2447_v37 = vld [vmem:[#allocation2 + $0x2c] ss:$16 sps:$4 sm:$0xff]  }
  0x34   :  { %1300 = vmatpush2.bf16.msra.mxu0 %v2355_v38  ;;  %v2420_v17 = vld [vmem:[#allocation2 + $0x484] ss:$16 sps:$4 sm:$0xff]   ;;  %v2418_v19 = vld [vmem:[#allocation2 + $0x480] ss:$16 sps:$4 sm:$0xff]  }
  0x35   :  { %1343 = vmatpush2.bf16.msra.mxu1 %v2356_v39  ;;  %1301 = vmatprep.subr.bf16.mxu0 %v2357_v40  ;;  %v2426_v21 = vld [vmem:[#allocation2 + $0x464] ss:$16 sps:$4 sm:$0xff]   ;;  %v2424_v23 = vld [vmem:[#allocation2 + $0x460] ss:$16 sps:$4 sm:$0xff]   ;;  %v2445_v39 = vld [vmem:[#allocation2 + $0x28] ss:$16 sps:$4 sm:$0xff]  }
  0x36   :  { %1344 = vmatprep.subr.bf16.mxu1 %v2359_v41  ;;  %v2432_v25 = vld [vmem:[#allocation2 + $0x444] ss:$16 sps:$4 sm:$0xff]   ;;  %v2430_v27 = vld [vmem:[#allocation2 + $0x440] ss:$16 sps:$4 sm:$0xff]   ;;  %v2453_v41 = vld [vmem:[#allocation2 + $0xc] ss:$16 sps:$4 sm:$0xff]  }
  0x37   :  { %v2438_v29 = vld [vmem:[#allocation2 + $0x424] ss:$16 sps:$4 sm:$0xff]   ;;  %v2436_v31 = vld [vmem:[#allocation2 + $0x420] ss:$16 sps:$4 sm:$0xff]  }
  0x38   :  { %1302 = vmatpush2.bf16.msra.mxu0 %v2361_v42  ;;  %v2753_v33 = vld [vmem:[%s2875_s0 + $0x14] ss:$28 sps:$4 sm:$0xff]  }
  0x39   :  { %1345 = vmatpush2.bf16.msra.mxu1 %v2362_v43  ;;  %1303 = vmatprep.subr.bf16.mxu0 %v2363_v44  ;;  %v2444_v34 = vld [vmem:[#allocation2 + $0x404] ss:$16 sps:$4 sm:$0xff]   ;;  %v2442_v36 = vld [vmem:[#allocation2 + $0x400] ss:$16 sps:$4 sm:$0xff]   ;;  %v2451_v43 = vld [vmem:[#allocation2 + $0x8] ss:$16 sps:$4 sm:$0xff]  }
  0x3a   :  { %1346 = vmatprep.subr.bf16.mxu1 %v2365_v45  ;;  %v2450_v38 = vld [vmem:[#allocation2 + $0x5e4] ss:$16 sps:$4 sm:$0xff]   ;;  %v2448_v40 = vld [vmem:[#allocation2 + $0x5e0] ss:$16 sps:$4 sm:$0xff]   ;;  %v2459_v45 = vld [vmem:[#allocation2 + $0x1ec] ss:$16 sps:$4 sm:$0xff]  }
  0x3b   :  { %v2456_v42 = vld [vmem:[#allocation2 + $0x5c4] ss:$16 sps:$4 sm:$0xff]   ;;  %v2454_v44 = vld [vmem:[#allocation2 + $0x5c0] ss:$16 sps:$4 sm:$0xff]  }
  0x3c   :  { %1304 = vmatpush2.bf16.msra.mxu0 %v2367_v46  ;;  %v2462_v46 = vld [vmem:[#allocation2 + $0x5a4] ss:$16 sps:$4 sm:$0xff]  }
  0x3d   :  { %1347 = vmatpush2.bf16.msra.mxu1 %v2368_v47  ;;  %1305 = vmatprep.subr.bf16.mxu0 %v2369_v48  ;;  %v2457_v47 = vld [vmem:[#allocation2 + $0x1e8] ss:$16 sps:$4 sm:$0xff]   ;;  %v2460_v48 = vld [vmem:[#allocation2 + $0x5a0] ss:$16 sps:$4 sm:$0xff]  }
  0x3e   :  { %1348 = vmatprep.subr.bf16.mxu1 %v2371_v50  ;;  %v2468_v50 = vld [vmem:[#allocation2 + $0x584] ss:$16 sps:$4 sm:$0xff]  }
  0x40   :  { %1306 = vmatpush2.bf16.msra.mxu0 %v2373_v52  ;;  %v2463_v52 = vld [vmem:[#allocation2 + $0x1c8] ss:$16 sps:$4 sm:$0xff]  }
  0x41   :  { %1349 = vmatpush2.bf16.msra.mxu1 %v2374_v53  ;;  %1307 = vmatprep.subr.bf16.mxu0 %v2375_v54  ;;  %v2466_v53 = vld [vmem:[#allocation2 + $0x580] ss:$16 sps:$4 sm:$0xff]   ;;  %v2471_v54 = vld [vmem:[#allocation2 + $0x1ac] ss:$16 sps:$4 sm:$0xff]  }
  0x42   :  { %1350 = vmatprep.subr.bf16.mxu1 %v2377_v55  ;;  %v2474_v55 = vld [vmem:[#allocation2 + $0x564] ss:$16 sps:$4 sm:$0xff]  }
  0x44   :  { %1308 = vmatpush2.bf16.msra.mxu0 %v2379_v56  ;;  %v2469_v56 = vld [vmem:[#allocation2 + $0x1a8] ss:$16 sps:$4 sm:$0xff]  }
  0x45   :  { %1351 = vmatpush2.bf16.msra.mxu1 %v2380_v57  ;;  %1309 = vmatprep.subr.bf16.mxu0 %v2381_v58  ;;  %v2472_v57 = vld [vmem:[#allocation2 + $0x560] ss:$16 sps:$4 sm:$0xff]   ;;  %v2477_v58 = vld [vmem:[#allocation2 + $0x18c] ss:$16 sps:$4 sm:$0xff]  }
  0x46   :  { %1352 = vmatprep.subr.bf16.mxu1 %v2383_v59  ;;  %v2480_v59 = vld [vmem:[#allocation2 + $0x544] ss:$16 sps:$4 sm:$0xff]  }
  0x48   :  { %1310 = vmatpush2.bf16.msra.mxu0 %v2385_v60  ;;  %v2475_v60 = vld [vmem:[#allocation2 + $0x188] ss:$16 sps:$4 sm:$0xff]  }
  0x49   :  { %1353 = vmatpush2.bf16.msra.mxu1 %v2386_v61  ;;  %1311 = vmatprep.subr.bf16.mxu0 %v2387_v62  ;;  %v2478_v61 = vld [vmem:[#allocation2 + $0x540] ss:$16 sps:$4 sm:$0xff]   ;;  %v2483_v62 = vld [vmem:[#allocation2 + $0x16c] ss:$16 sps:$4 sm:$0xff]  }
  0x4a   :  { %1354 = vmatprep.subr.bf16.mxu1 %v2389_v63  ;;  %v2486_v63 = vld [vmem:[#allocation2 + $0x524] ss:$16 sps:$4 sm:$0xff]  }
  0x4c   :  { %1312 = vmatpush2.bf16.msra.mxu0 %v2391_v0  ;;  %v2481_v0 = vld [vmem:[#allocation2 + $0x168] ss:$16 sps:$4 sm:$0xff]  }
  0x4d   :  { %1355 = vmatpush2.bf16.msra.mxu1 %v2392_v1  ;;  %1367 = vmatprep.subr.bf16.mxu0 %v2401_v2  ;;  %v2484_v1 = vld [vmem:[#allocation2 + $0x520] ss:$16 sps:$4 sm:$0xff]   ;;  %v2489_v2 = vld [vmem:[#allocation2 + $0x14c] ss:$16 sps:$4 sm:$0xff]  }
  0x4e   :  { %1424 = vmatprep.subr.bf16.mxu1 %v2404_v3  ;;  %v2492_v3 = vld [vmem:[#allocation2 + $0x504] ss:$16 sps:$4 sm:$0xff]  }
  0x4f   :  { %1314 = vmatmul.mubr.bf16.vlgmr.msra.gmra.mxu0 %v2732_v4 }
  0x50   :  { %1357 = vmatmul.mubr.bf16.vlgmr.msra.gmra.mxu1 %v2737_v5  ;;  %1368 = vmatpush1.bf16.msra.mxu0 %v2399_v6  ;;  %v2487_v6 = vld [vmem:[#allocation2 + $0x148] ss:$16 sps:$4 sm:$0xff]  }
  0x51   :  { %1425 = vmatpush1.bf16.msra.mxu1 %v2402_v7  ;;  %1369 = vmatprep.subr.bf16.mxu0 %v2407_v8  ;;  %v2490_v7 = vld [vmem:[#allocation2 + $0x500] ss:$16 sps:$4 sm:$0xff]   ;;  %v2498_v8 = vld [vmem:[#allocation2 + $0x12c] ss:$16 sps:$4 sm:$0xff]  }
  0x52   :  { %1442 = vmatprep.mubr.bf16.mxu1 %v2680_v11  ;;  %1453 = vmatprep.subr.bf16.mxu1 %v2410_v9  ;;  %v2501_v9 = vld [vmem:[#allocation2 + $0x2ec] ss:$16 sps:$4 sm:$0xff]  }
  0x53   :  { %1399 = vmatprep.mubr.bf16.mxu0 %v2753_v33 }
  0x54   :  { %1370 = vmatpush1.bf16.msra.mxu0 %v2405_v10  ;;  %v2759_v10 = vld [vmem:[%s2875_s0 + $0x10] ss:$28 sps:$4 sm:$0xff]  }
  0x55   :  { %1371 = vmatprep.subr.bf16.mxu0 %v2413_v12  ;;  %v2496_v12 = vld [vmem:[#allocation2 + $0x128] ss:$16 sps:$4 sm:$0xff]  }
  0x58   :  { %2209 = vmatmul.mubr.msk.bf16.vlgmr.msra.gmra.mxu1 %vm1277_vm0, %v2745_v14  ;;  %1372 = vmatpush1.bf16.msra.mxu0 %v2411_v15  ;;  %v2504_v15 = vld [vmem:[#allocation2 + $0x10c] ss:$16 sps:$4 sm:$0xff]  }
  0x59   :  { %1454 = vmatpush1.bf16.msra.mxu1 %v2408_v13  ;;  %1373 = vmatprep.subr.bf16.mxu0 %v2420_v17  ;;  %v2499_v13 = vld [vmem:[#allocation2 + $0x2e8] ss:$16 sps:$4 sm:$0xff]  }
  0x5a   :  { %1455 = vmatprep.subr.bf16.mxu1 %v2417_v16  ;;  %1485 = vmatprep.mubr.bf16.mxu1 %v2720_v49  ;;  %v2465_v49 = vld [vmem:[#allocation2 + $0x1cc] ss:$16 sps:$4 sm:$0xff]   ;;  %v2502_v17 = vld [vmem:[#allocation2 + $0x108] ss:$16 sps:$4 sm:$0xff]  }
  0x5b   :  { %v2507_v16 = vld [vmem:[#allocation2 + $0x2cc] ss:$16 sps:$4 sm:$0xff]  }
  0x5c   :  { %1374 = vmatpush1.bf16.msra.mxu0 %v2418_v19  ;;  %v2510_v19 = vld [vmem:[#allocation2 + $0x4ec] ss:$16 sps:$4 sm:$0xff]  }
  0x5d   :  { %1456 = vmatpush1.bf16.msra.mxu1 %v2415_v18  ;;  %1375 = vmatprep.subr.bf16.mxu0 %v2426_v21  ;;  %v2505_v18 = vld [vmem:[#allocation2 + $0x2c8] ss:$16 sps:$4 sm:$0xff]  }
  0x5e   :  { %1457 = vmatprep.subr.bf16.mxu1 %v2423_v20  ;;  %v2513_v20 = vld [vmem:[#allocation2 + $0x2ac] ss:$16 sps:$4 sm:$0xff]   ;;  %v2508_v21 = vld [vmem:[#allocation2 + $0x4e8] ss:$16 sps:$4 sm:$0xff]  }
  0x60   :  { %1376 = vmatpush1.bf16.msra.mxu0 %v2424_v23  ;;  %v2516_v23 = vld [vmem:[#allocation2 + $0x4cc] ss:$16 sps:$4 sm:$0xff]  }
  0x61   :  { %1458 = vmatpush1.bf16.msra.mxu1 %v2421_v22  ;;  %1377 = vmatprep.subr.bf16.mxu0 %v2432_v25  ;;  %v2511_v22 = vld [vmem:[#allocation2 + $0x2a8] ss:$16 sps:$4 sm:$0xff]  }
  0x62   :  { %1459 = vmatprep.subr.bf16.mxu1 %v2429_v24  ;;  %v2519_v24 = vld [vmem:[#allocation2 + $0x28c] ss:$16 sps:$4 sm:$0xff]   ;;  %v2514_v25 = vld [vmem:[#allocation2 + $0x4c8] ss:$16 sps:$4 sm:$0xff]  }
  0x64   :  { %1378 = vmatpush1.bf16.msra.mxu0 %v2430_v27  ;;  %v2522_v27 = vld [vmem:[#allocation2 + $0x4ac] ss:$16 sps:$4 sm:$0xff]  }
  0x65   :  { %1460 = vmatpush1.bf16.msra.mxu1 %v2427_v26  ;;  %1379 = vmatprep.subr.bf16.mxu0 %v2438_v29  ;;  %v2517_v26 = vld [vmem:[#allocation2 + $0x288] ss:$16 sps:$4 sm:$0xff]  }
  0x66   :  { %1461 = vmatprep.subr.bf16.mxu1 %v2435_v28  ;;  %v2525_v28 = vld [vmem:[#allocation2 + $0x26c] ss:$16 sps:$4 sm:$0xff]   ;;  %v2520_v29 = vld [vmem:[#allocation2 + $0x4a8] ss:$16 sps:$4 sm:$0xff]  }
  0x68   :  { %1380 = vmatpush1.bf16.msra.mxu0 %v2436_v31  ;;  %v2531_v31 = vld [vmem:[#allocation2 + $0x24c] ss:$16 sps:$4 sm:$0xff]  }
  0x69   :  { %1462 = vmatpush1.bf16.msra.mxu1 %v2433_v30  ;;  %1381 = vmatprep.subr.bf16.mxu0 %v2444_v34  ;;  %v2523_v30 = vld [vmem:[#allocation2 + $0x268] ss:$16 sps:$4 sm:$0xff]  }
  0x6a   :  { %1463 = vmatprep.subr.bf16.mxu1 %v2441_v32  ;;  %v2526_v32 = vld [vmem:[#allocation2 + $0x488] ss:$16 sps:$4 sm:$0xff]  }
  0x6b   :  { %v2529_v34 = vld [vmem:[#allocation2 + $0x248] ss:$16 sps:$4 sm:$0xff]  }
  0x6c   :  { %1382 = vmatpush1.bf16.msra.mxu0 %v2442_v36  ;;  %v2532_v36 = vld [vmem:[#allocation2 + $0x468] ss:$16 sps:$4 sm:$0xff]  }
  0x6d   :  { %1464 = vmatpush1.bf16.msra.mxu1 %v2439_v35  ;;  %1383 = vmatprep.subr.bf16.mxu0 %v2450_v38  ;;  %v2534_v35 = vld [vmem:[#allocation2 + $0x46c] ss:$16 sps:$4 sm:$0xff]  }
  0x6e   :  { %1465 = vmatprep.subr.bf16.mxu1 %v2447_v37  ;;  %v2535_v37 = vld [vmem:[#allocation2 + $0x228] ss:$16 sps:$4 sm:$0xff]   ;;  %v2540_v38 = vld [vmem:[#allocation2 + $0x44c] ss:$16 sps:$4 sm:$0xff]  }
  0x70   :  { %1384 = vmatpush2.bf16.msra.mxu0 %v2448_v40  ;;  %v2541_v40 = vld [vmem:[#allocation2 + $0x208] ss:$16 sps:$4 sm:$0xff]  }
  0x71   :  { %1466 = vmatpush1.bf16.msra.mxu1 %v2445_v39  ;;  %1385 = vmatprep.subr.bf16.mxu0 %v2456_v42  ;;  %v2543_v39 = vld [vmem:[#allocation2 + $0x20c] ss:$16 sps:$4 sm:$0xff]  }
  0x72   :  { %1467 = vmatprep.subr.bf16.mxu1 %v2453_v41  ;;  %v2546_v41 = vld [vmem:[#allocation2 + $0x42c] ss:$16 sps:$4 sm:$0xff]  }
  0x73   :  { %v2549_v42 = vld [vmem:[#allocation2 + $0x3ec] ss:$16 sps:$4 sm:$0xff]  }
  0x74   :  { %1386 = vmatpush2.bf16.msra.mxu0 %v2454_v44  ;;  %v2547_v44 = vld [vmem:[#allocation2 + $0x3e8] ss:$16 sps:$4 sm:$0xff]  }
  0x75   :  { %1468 = vmatpush1.bf16.msra.mxu1 %v2451_v43  ;;  %1387 = vmatprep.subr.bf16.mxu0 %v2462_v46  ;;  %v2544_v43 = vld [vmem:[#allocation2 + $0x428] ss:$16 sps:$4 sm:$0xff]   ;;  %v2555_v46 = vld [vmem:[#allocation2 + $0x3cc] ss:$16 sps:$4 sm:$0xff]  }
  0x76   :  { %1469 = vmatprep.subr.bf16.mxu1 %v2459_v45  ;;  %v2552_v45 = vld [vmem:[#allocation2 + $0x40c] ss:$16 sps:$4 sm:$0xff]  }
  0x78   :  { %1388 = vmatpush2.bf16.msra.mxu0 %v2460_v48  ;;  %v2553_v48 = vld [vmem:[#allocation2 + $0x3c8] ss:$16 sps:$4 sm:$0xff]  }
  0x79   :  { %1470 = vmatpush2.bf16.msra.mxu1 %v2457_v47  ;;  %1389 = vmatprep.subr.bf16.mxu0 %v2468_v50  ;;  %v2550_v47 = vld [vmem:[#allocation2 + $0x408] ss:$16 sps:$4 sm:$0xff]   ;;  %v2561_v50 = vld [vmem:[#allocation2 + $0x3ac] ss:$16 sps:$4 sm:$0xff]  }
  0x7a   :  { %1471 = vmatprep.subr.bf16.mxu1 %v2465_v49  ;;  %v2558_v49 = vld [vmem:[#allocation2 + $0x5ec] ss:$16 sps:$4 sm:$0xff]  }
  0x7c   :  { %1390 = vmatpush2.bf16.msra.mxu0 %v2466_v53  ;;  %v2559_v53 = vld [vmem:[#allocation2 + $0x3a8] ss:$16 sps:$4 sm:$0xff]  }
  0x7d   :  { %1472 = vmatpush2.bf16.msra.mxu1 %v2463_v52  ;;  %1391 = vmatprep.subr.bf16.mxu0 %v2474_v55  ;;  %v2556_v52 = vld [vmem:[#allocation2 + $0x5e8] ss:$16 sps:$4 sm:$0xff]   ;;  %v2567_v55 = vld [vmem:[#allocation2 + $0x38c] ss:$16 sps:$4 sm:$0xff]  }
  0x7e   :  { %1473 = vmatprep.subr.bf16.mxu1 %v2471_v54  ;;  %v2564_v54 = vld [vmem:[#allocation2 + $0x5cc] ss:$16 sps:$4 sm:$0xff]  }
  0x80   :  { %1392 = vmatpush2.bf16.msra.mxu0 %v2472_v57  ;;  %v2565_v57 = vld [vmem:[#allocation2 + $0x388] ss:$16 sps:$4 sm:$0xff]  }
  0x81   :  { %1474 = vmatpush2.bf16.msra.mxu1 %v2469_v56  ;;  %1393 = vmatprep.subr.bf16.mxu0 %v2480_v59  ;;  %v2562_v56 = vld [vmem:[#allocation2 + $0x5c8] ss:$16 sps:$4 sm:$0xff]   ;;  %v2573_v59 = vld [vmem:[#allocation2 + $0x36c] ss:$16 sps:$4 sm:$0xff]  }
  0x82   :  { %1475 = vmatprep.subr.bf16.mxu1 %v2477_v58  ;;  %v2570_v58 = vld [vmem:[#allocation2 + $0x5ac] ss:$16 sps:$4 sm:$0xff]  }
  0x84   :  { %1394 = vmatpush2.bf16.msra.mxu0 %v2478_v61  ;;  %v2571_v61 = vld [vmem:[#allocation2 + $0x368] ss:$16 sps:$4 sm:$0xff]  }
  0x85   :  { %1476 = vmatpush2.bf16.msra.mxu1 %v2475_v60  ;;  %1395 = vmatprep.subr.bf16.mxu0 %v2486_v63  ;;  %v2568_v60 = vld [vmem:[#allocation2 + $0x5a8] ss:$16 sps:$4 sm:$0xff]   ;;  %v2579_v63 = vld [vmem:[#allocation2 + $0x34c] ss:$16 sps:$4 sm:$0xff]  }
  0x86   :  { %1477 = vmatprep.subr.bf16.mxu1 %v2483_v62  ;;  %v2576_v62 = vld [vmem:[#allocation2 + $0x58c] ss:$16 sps:$4 sm:$0xff]  }
  0x88   :  { %1396 = vmatpush2.bf16.msra.mxu0 %v2484_v1  ;;  %v2577_v1 = vld [vmem:[#allocation2 + $0x348] ss:$16 sps:$4 sm:$0xff]  }
  0x89   :  { %1478 = vmatpush2.bf16.msra.mxu1 %v2481_v0  ;;  %1397 = vmatprep.subr.bf16.mxu0 %v2492_v3  ;;  %v2574_v0 = vld [vmem:[#allocation2 + $0x588] ss:$16 sps:$4 sm:$0xff]   ;;  %v2585_v3 = vld [vmem:[#allocation2 + $0x32c] ss:$16 sps:$4 sm:$0xff]  }
  0x8a   :  { %1479 = vmatprep.subr.bf16.mxu1 %v2489_v2  ;;  %v2582_v2 = vld [vmem:[#allocation2 + $0x56c] ss:$16 sps:$4 sm:$0xff]  }
  0x8c   :  { %1398 = vmatpush2.bf16.msra.mxu0 %v2490_v7  ;;  %v2583_v7 = vld [vmem:[#allocation2 + $0x328] ss:$16 sps:$4 sm:$0xff]  }
  0x8d   :  { %1480 = vmatpush2.bf16.msra.mxu1 %v2487_v6  ;;  %1496 = vmatprep.subr.bf16.mxu0 %v2501_v9  ;;  %v2580_v6 = vld [vmem:[#allocation2 + $0x568] ss:$16 sps:$4 sm:$0xff]   ;;  %v2591_v9 = vld [vmem:[#allocation2 + $0x30c] ss:$16 sps:$4 sm:$0xff]  }
  0x8e   :  { %1481 = vmatprep.subr.bf16.mxu1 %v2498_v8  ;;  %v2588_v8 = vld [vmem:[#allocation2 + $0x54c] ss:$16 sps:$4 sm:$0xff]  }
  0x8f   :  { %1400 = vmatmul.mubr.bf16.vlgmr.msra.gmra.mxu0 %v2759_v10 }
  0x90   :  { %1497 = vmatpush1.bf16.msra.mxu0 %v2499_v13  ;;  %1528 = vmatprep.mubr.bf16.mxu0 %v2725_v51  ;;  %v2528_v51 = vld [vmem:[#allocation2 + $0x48c] ss:$16 sps:$4 sm:$0xff]   ;;  %v2589_v13 = vld [vmem:[#allocation2 + $0x308] ss:$16 sps:$4 sm:$0xff]  }
  0x91   :  { %1482 = vmatpush2.bf16.msra.mxu1 %v2496_v12  ;;  %1498 = vmatprep.subr.bf16.mxu0 %v2507_v16  ;;  %v2586_v12 = vld [vmem:[#allocation2 + $0x548] ss:$16 sps:$4 sm:$0xff]   ;;  %v2597_v16 = vld [vmem:[#allocation2 + $0x60c] ss:$16 sps:$4 sm:$0xff]  }
  0x92   :  { %1483 = vmatprep.subr.bf16.mxu1 %v2504_v15  ;;  %v2594_v15 = vld [vmem:[#allocation2 + $0x52c] ss:$16 sps:$4 sm:$0xff]  }
  0x94   :  { %1499 = vmatpush1.bf16.msra.mxu0 %v2505_v18  ;;  %v2595_v18 = vld [vmem:[#allocation2 + $0x608] ss:$16 sps:$4 sm:$0xff]  }
  0x95   :  { %1484 = vmatpush2.bf16.msra.mxu1 %v2502_v17  ;;  %1500 = vmatprep.subr.bf16.mxu0 %v2513_v20  ;;  %v2592_v17 = vld [vmem:[#allocation2 + $0x528] ss:$16 sps:$4 sm:$0xff]  }
  0x96   :  { %1539 = vmatprep.subr.bf16.mxu1 %v2510_v19  ;;  %v2600_v19 = vld [vmem:[#allocation2 + $0x50c] ss:$16 sps:$4 sm:$0xff]  }
  0x97   :  { %v2601_v20 = vld [vmem:[%s2878_s3 + $0x78] sm:$0xff]  }
  0x98   :  { %1486 = vmatmul.mubr.bf16.vlgmr.msra.gmra.mxu1 %v2732_v4  ;;  %1501 = vmatpush1.bf16.msra.mxu0 %v2511_v22  ;;  %v2537_v4 = vld [vmem:[#allocation2 + $0x22c] ss:$16 sps:$4 sm:$0xff]  }
  0x99   :  { %1540 = vmatpush1.bf16.msra.mxu1 %v2508_v21  ;;  %1502 = vmatprep.subr.bf16.mxu0 %v2519_v24  ;;  %v2598_v21 = vld [vmem:[#allocation2 + $0x508] ss:$16 sps:$4 sm:$0xff]  }
  0x9a   :  { %1541 = vmatprep.subr.bf16.mxu1 %v2516_v23  ;;  %1571 = vmatprep.mubr.bf16.mxu1 %v2753_v33  ;;  %v2538_v33 = vld [vmem:[#allocation2 + $0x448] ss:$16 sps:$4 sm:$0xff]   ;;  %v2603_v23 = vld [vmem:[%s2878_s3 + $0x70] sm:$0xff]  }
  0x9b   :  { %v2602_v22 = vld [vmem:[%s2878_s3 + $0x38] sm:$0xff]   ;;  %v2606_v24 = vld [vmem:[%s2878_s3 + $0x28] sm:$0xff]  }
  0x9c   :  { %1503 = vmatpush1.bf16.msra.mxu0 %v2517_v26  ;;  %v2619_v26 = vld [vmem:[%s2878_s3 + $0xf0] sm:$0xff]  }
  0x9d   :  { %1542 = vmatpush1.bf16.msra.mxu1 %v2514_v25  ;;  %1504 = vmatprep.subr.bf16.mxu0 %v2525_v28  ;;  %v2618_v25 = vld [vmem:[%s2878_s3 + $0xb8] sm:$0xff]  }
  0x9e   :  { %1543 = vmatprep.subr.bf16.mxu1 %v2522_v27  ;;  %v2608_v27 = vld [vmem:[%s2878_s3 + $0x20] sm:$0xff]   ;;  %v2609_v28 = vld [vmem:[%s2878_s3 + $0x58] sm:$0xff]  }
  0xa0   :  { %1505 = vmatpush1.bf16.msra.mxu0 %v2523_v30  ;;  %v2621_v30 = vld [vmem:[%s2878_s3 + $0xe8] sm:$0xff]  }
  0xa1   :  { %1544 = vmatpush1.bf16.msra.mxu1 %v2520_v29  ;;  %1506 = vmatprep.subr.bf16.mxu0 %v2531_v31  ;;  %v2620_v29 = vld [vmem:[%s2878_s3 + $0xb0] sm:$0xff]  }
  0xa2   :  { %1545 = vmatprep.subr.bf16.mxu1 %v2528_v51  ;;  %v2610_v51 = vld [vmem:[%s2878_s3 + $0x18] sm:$0xff]   ;;  %v2611_v31 = vld [vmem:[%s2878_s3 + $0x50] sm:$0xff]  }
  0xa4   :  { %1507 = vmatpush1.bf16.msra.mxu0 %v2529_v34  ;;  %v2613_v34 = vld [vmem:[%s2878_s3 + $0x48] sm:$0xff]  }
  0xa5   :  { %1546 = vmatpush1.bf16.msra.mxu1 %v2526_v32  ;;  %1508 = vmatprep.subr.bf16.mxu0 %v2537_v4  ;;  %v2612_v32 = vld [vmem:[%s2878_s3 + $0x10] sm:$0xff]   ;;  %v2615_v4 = vld [vmem:[%s2878_s3 + $0x40] sm:$0xff]  }
  0xa6   :  { %1547 = vmatprep.subr.bf16.mxu1 %v2534_v35  ;;  %v2614_v35 = vld [vmem:[%s2878_s3 + $0x8] sm:$0xff]  }
  0xa8   :  { %1509 = vmatpush1.bf16.msra.mxu0 %v2535_v37  ;;  %v2622_v37 = vld [vmem:[%s2878_s3 + $0xa8] sm:$0xff]  }
  0xa9   :  { %1548 = vmatpush1.bf16.msra.mxu1 %v2532_v36  ;;  %1510 = vmatprep.subr.bf16.mxu0 %v2543_v39  ;;  %v2616_v36 = vld [vmem:[%s2878_s3] sm:$0xff]  }
  0xaa   :  { %1549 = vmatprep.subr.bf16.mxu1 %v2540_v38  ;;  %v2623_v38 = vld [vmem:[%s2878_s3 + $0xe0] sm:$0xff]  }
  0xab   :  { %v2624_v39 = vld [vmem:[%s2878_s3 + $0xa0] sm:$0xff]  }
  0xac   :  { %1511 = vmatpush1.bf16.msra.mxu0 %v2541_v40  ;;  %v2626_v40 = vld [vmem:[%s2878_s3 + $0x98] sm:$0xff]  }
  0xad   :  { %1550 = vmatpush1.bf16.msra.mxu1 %v2538_v33  ;;  %1512 = vmatprep.subr.bf16.mxu0 %v2549_v42  ;;  %v2625_v33 = vld [vmem:[%s2878_s3 + $0xd8] sm:$0xff]   ;;  %v2628_v42 = vld [vmem:[%s2878_s3 + $0x90] sm:$0xff]  }
  0xae   :  { %1551 = vmatprep.subr.bf16.mxu1 %v2546_v41  ;;  %v2627_v41 = vld [vmem:[%s2878_s3 + $0xd0] sm:$0xff]  }
  0xb0   :  { %1513 = vmatpush2.bf16.msra.mxu0 %v2547_v44  ;;  %v2630_v44 = vld [vmem:[%s2878_s3 + $0x88] sm:$0xff]  }
  0xb1   :  { %1552 = vmatpush1.bf16.msra.mxu1 %v2544_v43  ;;  %1514 = vmatprep.subr.bf16.mxu0 %v2555_v46  ;;  %v2629_v43 = vld [vmem:[%s2878_s3 + $0xc8] sm:$0xff]   ;;  %v2632_v46 = vld [vmem:[%s2878_s3 + $0x80] sm:$0xff]  }
  0xb2   :  { %1553 = vmatprep.subr.bf16.mxu1 %v2552_v45  ;;  %v2631_v45 = vld [vmem:[%s2878_s3 + $0xc0] sm:$0xff]  }
  0xb4   :  { %1515 = vmatpush2.bf16.msra.mxu0 %v2553_v48  ;;  %v242_v48 = vlaneseq }
  0xb5   :  { %1554 = vmatpush1.bf16.msra.mxu1 %v2550_v47  ;;  %1516 = vmatprep.subr.bf16.mxu0 %v2561_v50 }
  0xb6   :  { %1555 = vmatprep.subr.bf16.mxu1 %v2558_v49  ;;  %v243_v50 = vshrl.u32 %v242_v48, 7 }
  0xb8   :  { %1517 = vmatpush2.bf16.msra.mxu0 %v2559_v53 }
  0xb9   :  { %1556 = vmatpush2.bf16.msra.mxu1 %v2556_v52  ;;  %1518 = vmatprep.subr.bf16.mxu0 %v2567_v55  ;;  %v244_v55 = vsub.s32 0, %v243_v50 }
  0xba   :  { %1557 = vmatprep.subr.bf16.mxu1 %v2564_v54  ;;  %v248_v54 = vsub.s32 1, %v243_v50 }
  0xbc   :  { %1519 = vmatpush2.bf16.msra.mxu0 %v2565_v57  ;;  %v240_v57 = vld [vmem:[%s2877_s2] sm:$0xf] }
  0xbd   :  { %1558 = vmatpush2.bf16.msra.mxu1 %v2562_v56  ;;  %1520 = vmatprep.subr.bf16.mxu0 %v2573_v59  ;;  %v249_v59 = vrot.slane %v240_v57, %v248_v54 }
  0xbe   :  { %1559 = vmatprep.subr.bf16.mxu1 %v2570_v58 }
  0xc0   :  { %1521 = vmatpush2.bf16.msra.mxu0 %v2571_v61 }
  0xc1   :  { %1560 = vmatpush2.bf16.msra.mxu1 %v2568_v60  ;;  %1522 = vmatprep.subr.bf16.mxu0 %v2579_v63  ;;  %v245_v60 = vrot.slane %v240_v57, %v244_v55 }
  0xc2   :  { %1561 = vmatprep.subr.bf16.mxu1 %v2576_v62 }
  0xc4   :  { %1523 = vmatpush2.bf16.msra.mxu0 %v2577_v1 }
  0xc5   :  { %1562 = vmatpush2.bf16.msra.mxu1 %v2574_v0  ;;  %1524 = vmatprep.subr.bf16.mxu0 %v2585_v3 }
  0xc6   :  { %1563 = vmatprep.subr.bf16.mxu1 %v2582_v2 }
  0xc8   :  { %1525 = vmatpush2.bf16.msra.mxu0 %v2583_v7 }
  0xc9   :  { %1564 = vmatpush2.bf16.msra.mxu1 %v2580_v6  ;;  %1526 = vmatprep.subr.bf16.mxu0 %v2591_v9 }
  0xca   :  { %1565 = vmatprep.subr.bf16.mxu1 %v2588_v8 }
  0xcc   :  { %1527 = vmatpush2.bf16.msra.mxu0 %v2589_v13 }
  0xcd   :  { %1566 = vmatpush2.bf16.msra.mxu1 %v2586_v12  ;;  %1596 = vmatprep.subr.bf16.mxu0 %v2597_v16 }
  0xce   :  { %1567 = vmatprep.subr.bf16.mxu1 %v2594_v15 }
  0xcf   :  { %1529 = vmatmul.mubr.bf16.vlgmr.msra.gmra.mxu0 %v2737_v5  ;;  %v2604_v5 = vld [vmem:[%s2878_s3 + $0x30] sm:$0xff]  }
  0xd0   :  { %1597 = vmatpush1.bf16.msra.mxu0 %v2595_v18  ;;  %1614 = vmatprep.mubr.bf16.mxu0 %v2680_v11  ;;  %v2605_v11 = vld [vmem:[%s2878_s3 + $0x68] sm:$0xff]  }
  0xd1   :  { %1568 = vmatpush2.bf16.msra.mxu1 %v2592_v17  ;;  %2245 = vmatprep.subr.bf16.mxu0 %v2601_v20 }
  0xd2   :  { %1569 = vmatprep.subr.bf16.mxu1 %v2600_v19 }
  0xd5   :  { %1570 = vmatpush2.bf16.msra.mxu1 %v2598_v21 }
  0xd7   :  { %2210 = vmatmul.mubr.msk.bf16.vlgmr.msra.gmra.mxu0 %vm1277_vm0, %v2745_v14  ;;  %v2607_v14 = vld [vmem:[%s2878_s3 + $0x60] sm:$0xff]  }
  0xd8   :  { %1572 = vmatmul.mubr.bf16.vlgmr.msra.gmra.mxu1 %v2759_v10  ;;  %2246 = vmatpush3.bf16.msra.mxu0 %v2602_v22  ;;  %v2617_v10 = vld [vmem:[%s2878_s3 + $0xf8] ss:$0 sps:$4 sm:$0x33]  }
  0xd9   :  { %2247 = vmatprep.subr.bf16.mxu0 %v2603_v23  ;;  %2289 = vmatprep.subr.msk.bf16.mxu1 %vm1900_vm1, %v2617_v10 }
  0xda   :  { %2268 = vmatpush3.bf16.msra.mxu1 %v2618_v25 }
  0xdb   :  { %2269 = vmatprep.subr.bf16.mxu1 %v2619_v26 }
  0xdc   :  { %2248 = vmatpush3.bf16.msra.mxu0 %v2604_v5 }
  0xdd   :  { %2249 = vmatprep.subr.bf16.mxu0 %v2605_v11 }
  0xde   :  { %2270 = vmatpush3.bf16.msra.mxu1 %v2620_v29 }
  0xdf   :  { %2271 = vmatprep.subr.bf16.mxu1 %v2621_v30 }
  0xe0   :  { %2250 = vmatpush3.bf16.msra.mxu0 %v2606_v24 }
  0xe1   :  { %2251 = vmatprep.subr.bf16.mxu0 %v2607_v14 }
  0xe2   :  { %2272 = vmatpush3.bf16.msra.mxu1 %v2622_v37 }
  0xe3   :  { %2273 = vmatprep.subr.bf16.mxu1 %v2623_v38 }
  0xe4   :  { %2252 = vmatpush3.bf16.msra.mxu0 %v2608_v27 }
  0xe5   :  { %2253 = vmatprep.subr.bf16.mxu0 %v2609_v28 }
  0xe6   :  { %2274 = vmatpush3.bf16.msra.mxu1 %v2624_v39 }
  0xe7   :  { %2275 = vmatprep.subr.bf16.mxu1 %v2625_v33 }
  0xe8   :  { %2254 = vmatpush3.bf16.msra.mxu0 %v2610_v51 }
  0xe9   :  { %2255 = vmatprep.subr.bf16.mxu0 %v2611_v31  ;;  %v256_v31 = vsub.s32 3, %v243_v50 }
  0xea   :  { %2276 = vmatpush3.bf16.msra.mxu1 %v2626_v40 }
  0xeb   :  { %2277 = vmatprep.subr.bf16.mxu1 %v2627_v41 }
  0xec   :  { %2256 = vmatpush3.bf16.msra.mxu0 %v2612_v32  ;;  %v252_v32 = vsub.s32 2, %v243_v50 }
  0xed   :  { %2257 = vmatprep.subr.bf16.mxu0 %v2613_v34 }
  0xee   :  { %2278 = vmatpush3.bf16.msra.mxu1 %v2628_v42  ;;  %v253_v37 = vrot.slane %v240_v57, %v252_v32 }
  0xef   :  { %2279 = vmatprep.subr.bf16.mxu1 %v2629_v43 }
  0xf0   :  { %2258 = vmatpush3.bf16.msra.mxu0 %v2614_v35 }
  0xf1   :  { %2259 = vmatprep.subr.bf16.mxu0 %v2615_v4 }
  0xf2   :  { %2280 = vmatpush3.bf16.msra.mxu1 %v2630_v44 }
  0xf3   :  { %2281 = vmatprep.subr.bf16.mxu1 %v2631_v45 }
  0xf4   :  { %2260 = vmatpush3.bf16.msra.mxu0 %v2616_v36  ;;  %v257_v36 = vrot.slane %v240_v57, %v256_v31 }
  0xf6   :  { %2282 = vmatpush3.bf16.msra.mxu1 %v2632_v46 }
 0x10f   :  { %v1315_v52 = vpop.f32.mrf.mxu0 }
 0x110   :  { %v1358_v47 = vpop.f32.mrf.mxu1  ;;  %v1316_v0 = vadd.f32 %v1315_v52, %v245_v60 }
 0x111   :  { %v1317_v56 = vpop.f32.mrf.mxu0 }
 0x112   :  { %v1360_v49 = vpop.f32.mrf.mxu1  ;;  %v1318_v63 = vadd.f32 %v1317_v56, %v249_v59  ;;  %v1359_v9 = vadd.f32 %v1358_v47, %v1316_v0 }
 0x113   :  { %v1319_v61 = vpop.f32.mrf.mxu0 }
 0x114   :  { %v1362_v53 = vpop.f32.mrf.mxu1  ;;  %v1320_v2 = vadd.f32 %v1319_v61, %v245_v60  ;;  %v1361_v7 = vadd.f32 %v1360_v49, %v1318_v63 }
 0x115   :  { %v1321_v1 = vpop.f32.mrf.mxu0 }
 0x116   :  { %v1364_v58 = vpop.f32.mrf.mxu1  ;;  %v1322_v8 = vadd.f32 %v1321_v1, %v249_v59  ;;  %v1363_v13 = vadd.f32 %v1362_v53, %v1320_v2 }
 0x118   :  { %v1444_v62 = vpop.f32.mrf.mxu1  ;;  %v1365_v19 = vadd.f32 %v1364_v58, %v1322_v8 }
 0x11a   :  { %v1446_v3 = vpop.f32.mrf.mxu1 }
 0x11c   :  { %v1448_v16 = vpop.f32.mrf.mxu1 }
 0x11e   :  { %v1450_v11 = vpop.f32.mrf.mxu1 }
 0x14f   :  { %v1401_v6 = vpop.f32.mrf.mxu0 }
 0x150   :  { %v1402_v17 = vadd.f32 %v1401_v6, %v1359_v9 }
 0x151   :  { %v1403_v12 = vpop.f32.mrf.mxu0 }
 0x152   :  { %v1404_v15 = vadd.f32 %v1403_v12, %v1361_v7  ;;  %v1445_v24 = vadd.f32 %v1444_v62, %v1402_v17 }
 0x153   :  { %v1405_v18 = vpop.f32.mrf.mxu0 }
 0x154   :  { %v1406_v20 = vadd.f32 %v1405_v18, %v1363_v13  ;;  %v1447_v22 = vadd.f32 %v1446_v3, %v1404_v15  ;;  %v1625_v27 = vmax.f32 %v1445_v24, 0.0 }
 0x155   :  { %v1407_v21 = vpop.f32.mrf.mxu0 }
 0x156   :  { %v1449_v23 = vadd.f32 %v1448_v16, %v1406_v20  ;;  %v1408_v5 = vadd.f32 %v1407_v21, %v1365_v19  ;;  %v1626_v25 = vmax.f32 %v1447_v22, 0.0  ;;  %v2211_v16 = vld [vmem:[%s2879_s4] ss:$0 sm:$0xff] }
 0x158   :  { %v1451_v14 = vadd.f32 %v1450_v11, %v1408_v5  ;;  %v1629_v10 = vmax.f32 %v1449_v23, 0.0  ;;  %v1487_v30 = vpop.f32.mrf.mxu1 }
 0x159   :  { %v1488_v41 = vadd.f32 %v1487_v30, %v253_v37 }
 0x15a   :  { %v1630_v26 = vmax.f32 %v1451_v14, 0.0  ;;  %v1633_v29 = vpack.c.bf16 %v1629_v10, %v1625_v27  ;;  %v1489_v51 = vpop.f32.mrf.mxu1 }
 0x15b   :  { %v1490_v40 = vadd.f32 %v1489_v51, %v257_v36 }
 0x15c   :  { %v1634_v28 = vpack.c.bf16 %v1630_v26, %v1626_v25  ;;  %v1491_v35 = vpop.f32.mrf.mxu1 }
 0x15d   :  { %v1492_v44 = vadd.f32 %v1491_v35, %v253_v37 }
 0x15e   :  { %1936 = vmatprep.mubr.bf16.mxu0 %v1634_v28  ;;  %v1493_v39 = vpop.f32.mrf.mxu1 }
 0x15f   :  { %1937 = vmatmul.mubr.bf16.vlgmr.msra.gmra.mxu0 %v1633_v29  ;;  %v1494_v49 = vadd.f32 %v1493_v39, %v257_v36 }
 0x18f   :  { %v1530_v34 = vpop.f32.mrf.mxu0 }
 0x190   :  { %v1531_v46 = vadd.f32 %v1530_v34, %v1488_v41 }
 0x191   :  { %v1532_v4 = vpop.f32.mrf.mxu0 }
 0x192   :  { %v1533_v45 = vadd.f32 %v1532_v4, %v1490_v40 }
 0x193   :  { %v1534_v38 = vpop.f32.mrf.mxu0 }
 0x194   :  { %v1535_v52 = vadd.f32 %v1534_v38, %v1492_v44 }
 0x195   :  { %v1536_v33 = vpop.f32.mrf.mxu0 }
 0x196   :  { %v1537_v56 = vadd.f32 %v1536_v33, %v1494_v49 }
 0x197   :  { %v1616_v43 = vpop.f32.mrf.mxu0 }
 0x198   :  { %v1573_v42 = vpop.f32.mrf.mxu1 }
 0x199   :  { %v1618_v48 = vpop.f32.mrf.mxu0  ;;  %v1574_v53 = vadd.f32 %v1573_v42, %v1531_v46 }
 0x19a   :  { %v1575_v47 = vpop.f32.mrf.mxu1 }
 0x19b   :  { %v1576_v50 = vadd.f32 %v1575_v47, %v1533_v45  ;;  %v1620_v55 = vpop.f32.mrf.mxu0  ;;  %v1617_v63 = vadd.f32 %v1616_v43, %v1574_v53 }
 0x19c   :  { %v1577_v54 = vpop.f32.mrf.mxu1 }
 0x19d   :  { %v1578_v57 = vadd.f32 %v1577_v54, %v1535_v52  ;;  %v1622_v59 = vpop.f32.mrf.mxu0  ;;  %v1619_v60 = vadd.f32 %v1618_v48, %v1576_v50  ;;  %v1627_v6 = vmax.f32 %v1617_v63, 0.0 }
 0x19e   :  { %v1579_v58 = vpop.f32.mrf.mxu1 }
 0x19f   :  { %v1621_v61 = vadd.f32 %v1620_v55, %v1578_v57  ;;  %v1580_v62 = vadd.f32 %v1579_v58, %v1537_v56  ;;  %v1628_v2 = vmax.f32 %v1619_v60, 0.0 }
 0x1a1   :  { %v1623_v0 = vadd.f32 %v1622_v59, %v1580_v62  ;;  %v1631_v1 = vmax.f32 %v1621_v61, 0.0 }
 0x1a3   :  { %v1632_v3 = vmax.f32 %v1623_v0, 0.0  ;;  %v1635_v8 = vpack.c.bf16 %v1631_v1, %v1627_v6 }
 0x1a5   :  { %v1636_v7 = vpack.c.bf16 %v1632_v3, %v1628_v2 }
 0x1a7   :  { %2244 = vmatprep.mubr.msk.bf16.mxu1 %vm1896_vm2, %v1636_v7 }
 0x1a8   :  { %1978 = vmatmul.mubr.bf16.vlgmr.msra.gmra.mxu1 %v1635_v8 }
 0x21f   :  { %v2261_v9 = vpop.f32.mrf.mxu0 }
 0x221   :  { %v2262_v12 = vpop.f32.mrf.mxu0 }
 0x222   :  { %v2263_v15 = vadd.f32 %v2262_v12, %v2261_v9 }
 0x223   :  { %v2264_v13 = vpop.f32.mrf.mxu0 }
 0x224   :  { %v1939_v20 = vadd.f32 %v2263_v15, %v2211_v16 }
 0x225   :  { %v2265_v17 = vpop.f32.mrf.mxu0 }
 0x226   :  { %v2266_v21 = vadd.f32 %v2265_v17, %v2264_v13 }
 0x228   :  { %v1942_v24 = vadd.f32 %v2266_v21, %v2211_v16 }
 0x268   :  { %v2283_v18 = vpop.f32.mrf.mxu1 }
 0x26a   :  { %v2284_v19 = vpop.f32.mrf.mxu1 }
 0x26b   :  { %v2285_v22 = vadd.f32 %v2284_v19, %v2283_v18 }
 0x26c   :  { %v2286_v23 = vpop.f32.mrf.mxu1 }
 0x26d   :  { %v1980_v5 = vadd.f32 %v2285_v22, %v1939_v20 }
 0x26e   :  { %v2287_v11 = vpop.f32.mrf.mxu1 }
 0x26f   :  { %1987 = vst.msk [vmem:[#allocation5] sm:$0xff] %vm1986_vm3, %v1980_v5  ;;  %v2288_v14 = vadd.f32 %v2287_v11, %v2286_v23 }
 0x271   :  { %v1983_v10 = vadd.f32 %v2288_v14, %v1942_v24 }
 0x273   :  { %1988 = vst.msk [vmem:[#allocation5 + $0x8] sm:$0xff] %vm1986_vm3, %v1983_v10 }
 0x274   :  { %2664 = shalt.err (!%p2661_p9)
}
 0x275   :  { %s2682_s4 = smov 128   ;;  %s2683_s26 = smov 8  }
 0x276   :  { %2000 = dma.vmem_to_hbm [thread:$0]  %s1995_s1, 256, %s2880_s5, [#allocation4], %s2682_s4, %s2682_s4, %s2683_s26  }
 0x277   :  { %2675 = dma.done.wait [#allocation4], 256  }
 0x278   :  { %2676 = vsyncadd [#allocation4], 4294967040 }
 0x279   :  { %2004 = vsyncpa [#allocation3], 1 }
 0x27a   :  { %2005 = vsyncpa [#allocation4], 1 }

</bundles_post_ra>
